<compile_context>
chip_gen: v6e
topology: v6e:2x2x1
jax: 0.10.0
libtpu: 0.0.40
codegen_flags: <defaults>
</compile_context>

<pallas_src>
import functools
from types import SimpleNamespace

import jax
import jax.numpy as jnp
from jax import lax
from jax.experimental import pallas as pl
from jax.experimental.pallas import tpu as pltpu


def _round_up(a, m):
    return (a + m - 1) // m * m


# ----------------------------------------------------------------------------- tiled matmul (+ bias)

def _matmul_bias_kernel(x_ref, w_ref, b_ref, o_ref, acc_ref):
    @pl.when(pl.program_id(2) == 0)
    def _():
        acc_ref[...] = jnp.zeros_like(acc_ref)

    acc_ref[...] += jnp.dot(x_ref[...], w_ref[...],
                            preferred_element_type=jnp.float32)

    @pl.when(pl.program_id(2) == pl.num_programs(2) - 1)
    def _():
        o_ref[...] = (acc_ref[...] + b_ref[...]).astype(o_ref.dtype)


def _fit_tile(dim, tile, align):
    """Pick a tile and padded extent.  Small dims use a full-extent block (no pad)."""
    if dim <= tile:
        return dim, dim
    t = max(align, (tile // align) * align)
    return t, _round_up(dim, t)


def matmul_bias(x, w, b, out_dtype=jnp.float32, tm=256, tn=256, tk=512):
    """x:(M,K) @ w:(K,N) + b:(N,) -> (M,N). bf16 MXU operands, f32 accumulate, tiled grid.
    Operands are only padded when a dimension is genuinely ragged."""
    M, K = x.shape
    N = w.shape[1]
    tm, Mp = _fit_tile(M, tm, 8)
    tk, Kp = _fit_tile(K, tk, 128)
    tn, Np = _fit_tile(N, tn, 128)

    xp = x.astype(jnp.bfloat16)
    if (Mp, Kp) != (M, K):
        xp = jnp.zeros((Mp, Kp), jnp.bfloat16).at[:M, :K].set(xp)
    wp = w.astype(jnp.bfloat16)
    if (Kp, Np) != (K, N):
        wp = jnp.zeros((Kp, Np), jnp.bfloat16).at[:K, :N].set(wp)
    bp = jnp.reshape(b, (1, N)).astype(jnp.float32)
    if Np != N:
        bp = jnp.zeros((1, Np), jnp.float32).at[:, :N].set(bp)

    out = pl.pallas_call(
        _matmul_bias_kernel,
        out_shape=jax.ShapeDtypeStruct((Mp, Np), out_dtype),
        grid=(Mp // tm, Np // tn, Kp // tk),
        in_specs=[pl.BlockSpec((tm, tk), lambda i, j, k: (i, k)),
                  pl.BlockSpec((tk, tn), lambda i, j, k: (k, j)),
                  pl.BlockSpec((1, tn), lambda i, j, k: (0, j))],
        out_specs=pl.BlockSpec((tm, tn), lambda i, j, k: (i, j)),
        scratch_shapes=[pltpu.VMEM((tm, tn), jnp.float32)],
        compiler_params=pltpu.CompilerParams(
            dimension_semantics=("parallel", "parallel", "arbitrary")),
    )(xp, wp, bp)
    if (Mp, Np) != (M, N):
        out = out[:M, :N]
    return out


# ----------------------------------------------------------------------------- layernorm

def _ln_f32(x, g, b, eps=1e-5):
    m = jnp.mean(x, axis=-1, keepdims=True)
    v = jnp.mean((x - m) ** 2, axis=-1, keepdims=True)
    return (x - m) * lax.rsqrt(v + eps) * g + b


def _layernorm_kernel(x_ref, g_ref, b_ref, o_ref):
    x = x_ref[...].astype(jnp.float32)
    o_ref[...] = _ln_f32(x, g_ref[...], b_ref[...]).astype(o_ref.dtype)


def layernorm(x, g, b, out_dtype=jnp.float32, block_rows=512):
    """x: (N, D), g/b: (1, D). Row-tiled LayerNorm over the last axis in f32 (eps=1e-5)."""
    N, D = x.shape
    br = min(block_rows, _round_up(N, 8))
    Np = _round_up(N, br)
    xp = x if Np == N else jnp.zeros((Np, D), x.dtype).at[:N].set(x)
    out = pl.pallas_call(
        _layernorm_kernel,
        out_shape=jax.ShapeDtypeStruct((Np, D), out_dtype),
        grid=(Np // br,),
        in_specs=[pl.BlockSpec((br, D), lambda i: (i, 0)),
                  pl.BlockSpec((1, D), lambda i: (0, 0)),
                  pl.BlockSpec((1, D), lambda i: (0, 0))],
        out_specs=pl.BlockSpec((br, D), lambda i: (i, 0)),
        compiler_params=pltpu.CompilerParams(dimension_semantics=("parallel",)),
    )(xp, g, b)
    return out[:N]


# ----------------------------------------------------------------------------- attention block (x + MHA(LN1(x)))

def _pick_head_group(heads, dh):
    """Largest group G dividing `heads` with G*dh ~<= 256 lanes and 128-aligned slices
    (or G == heads, in which case blocks are full-extent and always legal)."""
    target = max(1, 256 // max(dh, 1))
    best = None
    for g in range(1, heads + 1):
        if heads % g:
            continue
        legal = (g == heads) or ((g * 3 * dh) % 128 == 0 and (g * dh) % 128 == 0)
        if legal and g <= target:
            best = g
    return heads if best is None else best


def _attn_block_kernel(x_ref, ln1g_ref, ln1b_ref, wqkv_ref, bqkv_ref, wo_ref, bo_ref,
                       o_ref, xn_ref, acc_ref, *, scale, group, dh):
    hg = pl.program_id(1)                                        # head-group index

    @pl.when(hg == 0)
    def _():
        # LN1 computed once per block, cached for all head groups (bf16 scratch).
        x = x_ref[0].astype(jnp.float32)
        xn_ref[...] = _ln_f32(x, ln1g_ref[...], ln1b_ref[...]).astype(jnp.bfloat16)
        acc_ref[...] = jnp.zeros_like(acc_ref)

    xn = xn_ref[...]                                             # (L, D) bf16
    # group-wide QKV projection: N = group*3*dh lanes, K = D
    qkv = jnp.dot(xn, wqkv_ref[...],
                  preferred_element_type=jnp.float32) + bqkv_ref[...]     # (L, group*3*dh) f32

    o_parts = []
    for g in range(group):                                       # static unroll (group is small)
        base = g * 3 * dh
        q = (qkv[:, base:base + dh] * scale).astype(jnp.bfloat16)
        k = qkv[:, base + dh:base + 2 * dh].astype(jnp.bfloat16)
        v = qkv[:, base + 2 * dh:base + 3 * dh].astype(jnp.bfloat16)
        # contract last axes directly; no materialized k.T transpose
        s = lax.dot_general(q, k, (((1,), (1,)), ((), ())),
                            preferred_element_type=jnp.float32)          # (L, L)
        s = s - jnp.max(s, axis=-1, keepdims=True)
        p = jnp.exp(s)
        p = p * pl.reciprocal(jnp.sum(p, axis=-1, keepdims=True), approx=True)
        o_parts.append(jnp.dot(p.astype(jnp.bfloat16), v,
                               preferred_element_type=jnp.float32))       # (L, dh)

    oc = o_parts[0] if group == 1 else jnp.concatenate(o_parts, axis=-1)  # (L, group*dh)
    # group-wide output projection (K = group*dh >= 128 for real head counts),
    # accumulated into the (L, D) f32 scratch -> no per-head concat over the full D.
    acc_ref[...] += jnp.dot(oc.astype(jnp.bfloat16), wo_ref[...],
                            preferred_element_type=jnp.float32)

    @pl.when(hg == pl.num_programs(1) - 1)
    def _():
        o_ref[0] = (x_ref[0].astype(jnp.float32) + acc_ref[...]
                    + bo_ref[...]).astype(o_ref.dtype)


def attn_block(x, p, heads):
    """x: (B, L, D) bf16 -> (B, L, D) bf16.  Grid (B, head_groups); group axis accumulates."""
    B, L, D = x.shape
    dh = D // heads
    group = _pick_head_group(heads, dh)
    n_groups = heads // group
    kernel = functools.partial(_attn_block_kernel,
                               scale=1.0 / (dh ** 0.5), group=group, dh=dh)
    return pl.pallas_call(
        kernel,
        out_shape=jax.ShapeDtypeStruct((B, L, D), x.dtype),
        grid=(B, n_groups),
        in_specs=[
            pl.BlockSpec((1, L, D), lambda b, h: (b, 0, 0)),              # x (resident over groups)
            pl.BlockSpec((1, D), lambda b, h: (0, 0)),                    # ln1 gamma
            pl.BlockSpec((1, D), lambda b, h: (0, 0)),                    # ln1 beta
            pl.BlockSpec((D, group * 3 * dh), lambda b, h: (0, h)),       # per-group [q|k|v] cols
            pl.BlockSpec((1, group * 3 * dh), lambda b, h: (0, h)),       # per-group qkv bias
            pl.BlockSpec((group * dh, D), lambda b, h: (h, 0)),           # per-group Wout rows
            pl.BlockSpec((1, D), lambda b, h: (0, 0)),                    # out-proj bias
        ],
        out_specs=pl.BlockSpec((1, L, D), lambda b, h: (b, 0, 0)),
        scratch_shapes=[pltpu.VMEM((L, D), jnp.bfloat16),                 # cached LN1(x)
                        pltpu.VMEM((L, D), jnp.float32)],                 # output accumulator
        compiler_params=pltpu.CompilerParams(
            dimension_semantics=("parallel", "arbitrary"),
            vmem_limit_bytes=64 * 1024 * 1024),
    )(x, p["ln1_g"], p["ln1_b"], p["w_qkv_hm"], p["b_qkv_hm"], p["w_out"], p["b_out"])


# ----------------------------------------------------------------------------- MLP block (x + c_proj(QuickGELU(c_fc(LN2(x)))))

def _mlp_block_kernel(x_ref, ln2g_ref, ln2b_ref, wfc_ref, bfc_ref, wpr_ref, bpr_ref,
                      o_ref, acc_ref, h_ref):
    c = pl.program_id(1)                                         # hidden-chunk index

    @pl.when(c == 0)
    def _():
        x = x_ref[0].astype(jnp.float32)
        h_ref[...] = _ln_f32(x, ln2g_ref[...], ln2b_ref[...]).astype(jnp.bfloat16)
        acc_ref[...] = jnp.zeros_like(acc_ref)

    m = jnp.dot(h_ref[...], wfc_ref[...],
                preferred_element_type=jnp.float32) + bfc_ref[...]        # (L, ck) f32
    m = m * jax.nn.sigmoid(1.702 * m)                            # QuickGELU (f32)
    acc_ref[...] += jnp.dot(m.astype(jnp.bfloat16), wpr_ref[...],
                            preferred_element_type=jnp.float32)

    @pl.when(c == pl.num_programs(1) - 1)
    def _():
        o_ref[0] = (x_ref[0].astype(jnp.float32) + acc_ref[...]
                    + bpr_ref[...]).astype(o_ref.dtype)


def mlp_block(x, p):
    """Hidden dim is gridded (arbitrary axis) so c_fc / c_proj weight chunks are
    pipelined by BlockSpec instead of pinned whole in VMEM."""
    B, L, D = x.shape
    H = p["w_fc"].shape[1]
    ck = H if H <= 512 else 512
    if H % ck or (ck < H and ck % 128):
        ck = H
    return pl.pallas_call(
        _mlp_block_kernel,
        out_shape=jax.ShapeDtypeStruct((B, L, D), x.dtype),
        grid=(B, H // ck),
        in_specs=[
            pl.BlockSpec((1, L, D), lambda b, c: (b, 0, 0)),
            pl.BlockSpec((1, D), lambda b, c: (0, 0)),
            pl.BlockSpec((1, D), lambda b, c: (0, 0)),
            pl.BlockSpec((D, ck), lambda b, c: (0, c)),          # c_fc chunk
            pl.BlockSpec((1, ck), lambda b, c: (0, c)),          # c_fc bias chunk
            pl.BlockSpec((ck, D), lambda b, c: (c, 0)),          # c_proj chunk
            pl.BlockSpec((1, D), lambda b, c: (0, 0)),
        ],
        out_specs=pl.BlockSpec((1, L, D), lambda b, c: (b, 0, 0)),
        scratch_shapes=[pltpu.VMEM((L, D), jnp.float32),         # accumulator
                        pltpu.VMEM((L, D), jnp.bfloat16)],       # cached LN2(x)
        compiler_params=pltpu.CompilerParams(
            dimension_semantics=("parallel", "arbitrary"),
            vmem_limit_bytes=64 * 1024 * 1024),
    )(x, p["ln2_g"], p["ln2_b"], p["w_fc"], p["b_fc"], p["w_proj"], p["b_proj"])


# ----------------------------------------------------------------------------- parameters

def init_params(key, cfg):
    D = cfg.width
    heads = cfg.heads
    assert D % heads == 0
    dh = D // heads
    scale = D ** -0.5
    kit = iter(jax.random.split(key, 8 + 4 * cfg.layers))

    p = {}
    p["token_type_embeddings"] = scale * jax.random.normal(next(kit), (2, D), jnp.float32)
    p["class_embedding"] = scale * jax.random.normal(next(kit), (D,), jnp.float32)
    n_pos = (cfg.input_resolution // cfg.patch_size) ** 2 + 1
    p["image_positional_embedding"] = scale * jax.random.normal(next(kit), (n_pos, D), jnp.float32)
    p["text_positional_embedding"] = scale * jax.random.normal(next(kit), (cfg.context_length, D), jnp.float32)
    p["temporal_positional_embedding"] = jnp.zeros((1, cfg.num_frames, D), jnp.float32)
    p["conv1_w"] = 0.02 * jax.random.normal(
        next(kit), (D, 3, cfg.kernel_size, cfg.patch_size, cfg.patch_size), jnp.float32)
    p["token_embedding"] = 0.02 * jax.random.normal(next(kit), (cfg.vocab_size, D), jnp.float32)
    for name in ("image_pre_norm", "image_post_norm", "text_post_norm"):
        p[name + "_g"] = jnp.ones((1, D), jnp.float32)
        p[name + "_b"] = jnp.zeros((1, D), jnp.float32)
    p["text_projection"] = 0.02 * jax.random.normal(next(kit), (D, cfg.output_dim), jnp.float32)
    p["image_projection"] = 0.02 * jax.random.normal(next(kit), (D, cfg.output_dim), jnp.float32)

    def pack_qkv_cols(w_qkv):
        # (D, 3D) [q_all|k_all|v_all] -> (D, heads*3*dh) with per-head column groups [q_h|k_h|v_h]
        # NOTE: when loading real PyTorch in_proj_weight ((out,in)), transpose before this repack.
        wq = w_qkv[:, 0:D].reshape(D, heads, dh)
        wk = w_qkv[:, D:2 * D].reshape(D, heads, dh)
        wv = w_qkv[:, 2 * D:3 * D].reshape(D, heads, dh)
        return jnp.concatenate([wq, wk, wv], axis=-1).reshape(D, heads * 3 * dh)

    blocks = []
    for _ in range(cfg.layers):
        k1, k2, k3, k4 = (next(kit) for _ in range(4))
        w_qkv = 0.02 * jax.random.normal(k1, (D, 3 * D), jnp.float32)   # in_proj, x@W orientation
        w_out = 0.02 * jax.random.normal(k2, (D, D), jnp.float32)       # out_proj, x@W orientation
        w_fc = 0.02 * jax.random.normal(k3, (D, 4 * D), jnp.float32)
        w_pr = 0.02 * jax.random.normal(k4, (4 * D, D), jnp.float32)
        blocks.append({
            "ln1_g": jnp.ones((1, D), jnp.float32), "ln1_b": jnp.zeros((1, D), jnp.float32),
            "w_qkv_hm": pack_qkv_cols(w_qkv).astype(jnp.bfloat16),       # (D, heads*3*dh)
            "b_qkv_hm": jnp.zeros((1, heads * 3 * dh), jnp.float32),
            "w_out": w_out.astype(jnp.bfloat16),                          # (D, D), rows head-major
            "b_out": jnp.zeros((1, D), jnp.float32),
            "ln2_g": jnp.ones((1, D), jnp.float32), "ln2_b": jnp.zeros((1, D), jnp.float32),
            "w_fc": w_fc.astype(jnp.bfloat16), "b_fc": jnp.zeros((1, 4 * D), jnp.float32),
            "w_proj": w_pr.astype(jnp.bfloat16), "b_proj": jnp.zeros((1, D), jnp.float32),
        })
    p["blocks"] = blocks
    return p


# ----------------------------------------------------------------------------- forward

def forward_image(params, cfg, image):
    # encode_vision: (B, T, C, H, W) -> (B, C, T, H, W)   (or unsqueeze for 4-D input)
    if image.ndim == 5:
        image = jnp.transpose(image, (0, 2, 1, 3, 4))
    else:
        image = image[:, :, None, :, :]
    B, C, T, H, W = image.shape
    kt, ps, D = cfg.kernel_size, cfg.patch_size, cfg.width
    Tt, Hp, Wp = T // kt, H // ps, W // ps
    n = Hp * Wp

    # Conv3d(3->width, (kt,ps,ps), stride=(kt,ps,ps), bias=False) as patch-unfold + tiled matmul
    xp = image.reshape(B, C, Tt, kt, Hp, ps, Wp, ps)
    xp = xp.transpose(0, 2, 4, 6, 1, 3, 5, 7).reshape(B * Tt * n, C * kt * ps * ps)
    w_conv = params["conv1_w"].reshape(D, C * kt * ps * ps).T
    feat = matmul_bias(xp, w_conv, jnp.zeros((D,), jnp.float32),
                       tm=512, tn=512, tk=512)                            # (B*Tt*n, D)
    x = feat.reshape(B * Tt, n, D)

    # class token + spatial positional embedding (per frame)
    cls_tok = params["class_embedding"][None, None, :] + jnp.zeros((B * Tt, 1, D), jnp.float32)
    x = jnp.concatenate([cls_tok, x], axis=1)                             # (B*Tt, n+1, D)
    x = x + params["image_positional_embedding"][None]

    # temporal positional embedding  (ViCLIP rearrange pattern)
    # TODO(synk): mirrors ViCLIP's cls-selection quirk (first B rows of the (B*Tt)-flattened axis);
    #             verify against the elided forward_image body.
    cls_tokens = x[:B, :1, :]
    xs = x[:, 1:, :].reshape(B, Tt, n, D).transpose(0, 2, 1, 3)           # (B, n, Tt, D)
    xs = xs + params["temporal_positional_embedding"][:, :Tt][:, None, :, :]
    xs = xs.reshape(B, n * Tt, D)
    x = jnp.concatenate([cls_tokens, xs], axis=1)                         # (B, 1+n*Tt, D)

    # unified encoder: token type 0 = vision
    x = x + params["token_type_embeddings"][0][None, None, :]

    L = x.shape[1]
    x = layernorm(x.reshape(B * L, D), params["image_pre_norm_g"],
                  params["image_pre_norm_b"], out_dtype=jnp.bfloat16).reshape(B, L, D)
    for blk in params["blocks"]:
        x = attn_block(x, blk, cfg.heads)
        x = mlp_block(x, blk)
    x = layernorm(x.reshape(B * L, D), params["image_post_norm_g"],
                  params["image_post_norm_b"], out_dtype=jnp.float32).reshape(B, L, D)

    cls_out = x[:, 0, :]                                                  # (B, D)
    return matmul_bias(cls_out, params["image_projection"],
                       jnp.zeros((cfg.output_dim,), jnp.float32))


def forward_text(params, cfg, text_tokens):
    # TODO(synk): SimpleTokenizer (BPE file + regex string processing) has no Pallas
    #             equivalent; this takes pre-tokenized int32 tokens (B, context_length).
    B, L = text_tokens.shape
    D = cfg.width
    x = jnp.take(params["token_embedding"], text_tokens, axis=0)          # row gather (no one-hot matmul)
    x = x + params["text_positional_embedding"][:L][None]
    x = x + params["token_type_embeddings"][1][None, None, :]
    x = x.astype(jnp.bfloat16)

    for blk in params["blocks"]:
        x = attn_block(x, blk, cfg.heads)
        x = mlp_block(x, blk)
    x = layernorm(x.reshape(B * L, D), params["text_post_norm_g"],
                  params["text_post_norm_b"], out_dtype=jnp.float32).reshape(B, L, D)

    eot_idx = jnp.argmax(text_tokens, axis=-1)                            # CLIP-style eot pooling
    pooled = x[jnp.arange(B), eot_idx]                                    # (B, D)
    return matmul_bias(pooled, params["text_projection"],
                       jnp.zeros((cfg.output_dim,), jnp.float32))


def unified_encoder_forward(params, cfg, image, text_tokens,
                            input_text_only=False, input_video_only=False):
    assert not input_text_only and (not input_video_only)
    image_embeds = forward_image(params, cfg, image)
    text_embeds = forward_text(params, cfg, text_tokens)
    return image_embeds, text_embeds


# ----------------------------------------------------------------------------- main

if __name__ == "__main__":
    cfg = SimpleNamespace(width=32, layers=2, heads=2,
                          input_resolution=16, patch_size=8,
                          kernel_size=2, num_frames=4,
                          context_length=8, vocab_size=64,
                          output_dim=16, masking_prob=0.0)

    key = jax.random.PRNGKey(0)
    k_param, k_img, k_txt = jax.random.split(key, 3)

    params = init_params(k_param, cfg)

    B = 2
    # image: (B, T, C, H, W) like the PyTorch forward's 5-D video input
    image = jax.random.normal(
        k_img, (B, cfg.num_frames, 3, cfg.input_resolution, cfg.input_resolution), jnp.float32)
    # text: pre-tokenized ids; force an "eot" (max id) at the last position
    text = jax.random.randint(k_txt, (B, cfg.context_length), 1, cfg.vocab_size - 1).astype(jnp.int32)
    text = text.at[:, -1].set(cfg.vocab_size - 1)

    img_emb, txt_emb = unified_encoder_forward(params, cfg, image, text)
    jax.block_until_ready(img_emb)
    jax.block_until_ready(txt_emb)

    assert img_emb.shape == (B, cfg.output_dim), img_emb.shape
    assert txt_emb.shape == (B, cfg.output_dim), txt_emb.shape
    print("KERNEL_OK")
</pallas_src>

<mosaic_0001>
module attributes {stable_mosaic.version = 11 : i64} {
  func.func @_matmul_bias_kernel(%arg0: i32, %arg1: i32, %arg2: i32, %arg3: memref<16x384xbf16, #tpu.memory_space<vmem>>, %arg4: memref<384x32xbf16, #tpu.memory_space<vmem>>, %arg5: memref<1x32xf32, #tpu.memory_space<vmem>>, %arg6: memref<16x32xf32, #tpu.memory_space<vmem>>, %arg7: memref<16x32xf32, #tpu.memory_space<vmem>>) attributes {dimension_semantics = [#tpu.dimension_semantics<parallel>, #tpu.dimension_semantics<parallel>, #tpu.dimension_semantics<arbitrary>], iteration_bounds = array<i64: 1, 1, 1>, scalar_prefetch = 0 : i64, scratch_operands = 1 : i64, tpu.core_type = #tpu.core_type<tc>, window_params = [{transform_indices = @transform_0, window_bounds = array<i64: 16, 384>}, {transform_indices = @transform_1, window_bounds = array<i64: 384, 32>}, {transform_indices = @transform_2, window_bounds = array<i64: 1, 32>}, {transform_indices = @transform_3, window_bounds = array<i64: 16, 32>}]} {
    %c0_i32 = arith.constant 0 : i32
    %0 = arith.cmpi eq, %arg2, %c0_i32 : i32
    %1 = arith.extui %0 : i1 to i32
    %c0_i32_0 = arith.constant 0 : i32
    %2 = arith.cmpi ne, %1, %c0_i32_0 : i32
    scf.if %2 {
      %cst_10 = arith.constant 0.000000e+00 : f32
      %12 = vector.broadcast %cst_10 : f32 to vector<16x32xf32>
      %c0_11 = arith.constant 0 : index
      %c0_12 = arith.constant 0 : index
      %13 = vector.load %arg7[%c0_11, %c0_12] : memref<16x32xf32, #tpu.memory_space<vmem>>, vector<16x32xf32>
      tpu.vector_store %arg7[%c0_11, %c0_12], %12 {strides = array<i32>} : memref<16x32xf32, #tpu.memory_space<vmem>>, vector<16x32xf32>,
    } else {
    }
    %c0 = arith.constant 0 : index
    %c0_1 = arith.constant 0 : index
    %3 = vector.load %arg7[%c0, %c0_1] : memref<16x32xf32, #tpu.memory_space<vmem>>, vector<16x32xf32>
    %c0_2 = arith.constant 0 : index
    %c0_3 = arith.constant 0 : index
    %4 = vector.load %arg3[%c0_2, %c0_3] : memref<16x384xbf16, #tpu.memory_space<vmem>>, vector<16x384xbf16>
    %c0_4 = arith.constant 0 : index
    %c0_5 = arith.constant 0 : index
    %5 = vector.load %arg4[%c0_4, %c0_5] : memref<384x32xbf16, #tpu.memory_space<vmem>>, vector<384x32xbf16>
    %cst = arith.constant dense<0.000000e+00> : vector<16x32xf32>
    %6 = tpu.matmul %4, %5, %cst {dimension_numbers = #tpu.dot_dimension_numbers<[1], [0], [0], [1], [0, 0, 1, 1], [], []>} : vector<16x384xbf16>, vector<384x32xbf16>, vector<16x32xf32> -> vector<16x32xf32>
    %7 = arith.addf %3, %6 : vector<16x32xf32>
    %c0_6 = arith.constant 0 : index
    %c0_7 = arith.constant 0 : index
    %8 = vector.load %arg7[%c0_6, %c0_7] : memref<16x32xf32, #tpu.memory_space<vmem>>, vector<16x32xf32>
    tpu.vector_store %arg7[%c0_6, %c0_7], %7 {strides = array<i32>} : memref<16x32xf32, #tpu.memory_space<vmem>>, vector<16x32xf32>,
    %c0_i32_8 = arith.constant 0 : i32
    %9 = arith.cmpi eq, %arg2, %c0_i32_8 : i32
    %10 = arith.extui %9 : i1 to i32
    %c0_i32_9 = arith.constant 0 : i32
    %11 = arith.cmpi ne, %10, %c0_i32_9 : i32
    scf.if %11 {
      %c0_10 = arith.constant 0 : index
      %c0_11 = arith.constant 0 : index
      %12 = vector.load %arg7[%c0_10, %c0_11] : memref<16x32xf32, #tpu.memory_space<vmem>>, vector<16x32xf32>
      %c0_12 = arith.constant 0 : index
      %c0_13 = arith.constant 0 : index
      %13 = vector.load %arg5[%c0_12, %c0_13] : memref<1x32xf32, #tpu.memory_space<vmem>>, vector<1x32xf32>
      %14 = vector.broadcast %13 : vector<1x32xf32> to vector<16x32xf32>
      %15 = arith.addf %12, %14 : vector<16x32xf32>
      %c0_14 = arith.constant 0 : index
      %c0_15 = arith.constant 0 : index
      %16 = vector.load %arg6[%c0_14, %c0_15] : memref<16x32xf32, #tpu.memory_space<vmem>>, vector<16x32xf32>
      tpu.vector_store %arg6[%c0_14, %c0_15], %15 {strides = array<i32>} : memref<16x32xf32, #tpu.memory_space<vmem>>, vector<16x32xf32>,
    } else {
    }
    return
  }
  func.func @transform_0(%arg0: i32, %arg1: i32, %arg2: i32) -> (i32, i32) {
    %c0_i32 = arith.constant 0 : i32
    return %arg0, %arg2 : i32, i32
  }
  func.func @transform_1(%arg0: i32, %arg1: i32, %arg2: i32) -> (i32, i32) {
    %c0_i32 = arith.constant 0 : i32
    return %arg2, %arg1 : i32, i32
  }
  func.func @transform_2(%arg0: i32, %arg1: i32, %arg2: i32) -> (i32, i32) {
    %c0_i32 = arith.constant 0 : i32
    %c0_i32_0 = arith.constant 0 : i32
    return %c0_i32, %arg1 : i32, i32
  }
  func.func @transform_3(%arg0: i32, %arg1: i32, %arg2: i32) -> (i32, i32) {
    %c0_i32 = arith.constant 0 : i32
    return %arg0, %arg1 : i32, i32
  }
}

</mosaic_0001>

<bundles_post_ra>
// kernel: tpu_custom_call.1
= control target key start
LH: loop header
LB: loop body
LE: loop exit
PB: predicated region body
PF: predicated region fallthrough
CT: control target
= control target key end

     0   :  { %v490_v1 = vmov 0.0   ;;  %vm491_vm0 = vmmov 0   ;;  %s619_s0 = inlined_call_operand.vmem [shape: bf16[16,384], index: 0, kind: input, shape index: {}]   ;;  %s620_s1 = inlined_call_operand.vmem [shape: bf16[384,32], index: 1, kind: input, shape index: {}]   ;;  %s621_s2 = inlined_call_operand.vmem [shape: f32[1,32], index: 2, kind: input, shape index: {}]   ;;  %s622_s3 = inlined_call_operand.hbm [shape: f32[16,32], index: 3, kind: output, shape index: {}]  }
   0x1   :  { %v440_v0 = vld [vmem:[%s620_s1 + $0x78] sm:$0xff]   ;;  %415 = vmatprep.subr.bf16.mxu1 %v490_v1  ;;  %431 = vmatprep.mubr.msk.bf16.mxu1 %vm491_vm0, %v490_v1  ;;  %v443_v4 = vld [vmem:[%s620_s1 + $0x70] sm:$0xff]   ;;  %v446_v7 = vld [vmem:[%s620_s1 + $0x68] sm:$0xff]  }
   0x2   :  { %v441_v2 = vld [vmem:[%s620_s1 + $0xb8] sm:$0xff]   ;;  %384 = vmatprep.subr.bf16.mxu0 %v440_v0  ;;  %v444_v5 = vld [vmem:[%s620_s1 + $0xb0] sm:$0xff]   ;;  %v447_v8 = vld [vmem:[%s620_s1 + $0xa8] sm:$0xff]  }
   0x3   :  { %v442_v3 = vld [vmem:[%s620_s1 + $0x38] sm:$0xff]   ;;  %416 = vmatpush3.bf16.msra.mxu1 %v441_v2  ;;  %v445_v6 = vld [vmem:[%s620_s1 + $0x30] sm:$0xff]   ;;  %v448_v9 = vld [vmem:[%s620_s1 + $0x28] sm:$0xff]  }
   0x4   :  { %385 = vmatpush3.bf16.msra.mxu0 %v442_v3  ;;  %417 = vmatprep.subr.bf16.mxu1 %v490_v1  ;;  %v449_v10 = vld [vmem:[%s620_s1 + $0x60] sm:$0xff]   ;;  %v452_v13 = vld [vmem:[%s620_s1 + $0x58] sm:$0xff]   ;;  %v455_v16 = vld [vmem:[%s620_s1 + $0x50] sm:$0xff]  }
   0x5   :  { %386 = vmatprep.subr.bf16.mxu0 %v443_v4  ;;  %v450_v11 = vld [vmem:[%s620_s1 + $0xa0] sm:$0xff]   ;;  %v453_v14 = vld [vmem:[%s620_s1 + $0x98] sm:$0xff]   ;;  %v456_v17 = vld [vmem:[%s620_s1 + $0x90] sm:$0xff]  }
   0x6   :  { %v451_v12 = vld [vmem:[%s620_s1 + $0x20] sm:$0xff]   ;;  %v454_v15 = vld [vmem:[%s620_s1 + $0x18] sm:$0xff]   ;;  %v457_v18 = vld [vmem:[%s620_s1 + $0x10] sm:$0xff]  }
   0x7   :  { %418 = vmatpush3.bf16.msra.mxu1 %v444_v5  ;;  %v458_v19 = vld [vmem:[%s620_s1 + $0x48] sm:$0xff]   ;;  %v461_v22 = vld [vmem:[%s620_s1 + $0x40] sm:$0xff]  }
   0x8   :  { %387 = vmatpush3.bf16.msra.mxu0 %v445_v6  ;;  %419 = vmatprep.subr.bf16.mxu1 %v490_v1  ;;  %v459_v20 = vld [vmem:[%s620_s1 + $0x88] sm:$0xff]   ;;  %v466_v23 = vld [vmem:[%s619_s0 + $0x4] ss:$12 sps:$4 sm:$0xff]  }
   0x9   :  { %388 = vmatprep.subr.bf16.mxu0 %v446_v7  ;;  %v460_v21 = vld [vmem:[%s620_s1 + $0x8] sm:$0xff]  }
   0xb   :  { %420 = vmatpush3.bf16.msra.mxu1 %v447_v8 }
   0xc   :  { %389 = vmatpush3.bf16.msra.mxu0 %v448_v9  ;;  %421 = vmatprep.subr.bf16.mxu1 %v490_v1 }
   0xd   :  { %390 = vmatprep.subr.bf16.mxu0 %v449_v10 }
   0xf   :  { %422 = vmatpush3.bf16.msra.mxu1 %v450_v11 }
  0x10   :  { %391 = vmatpush3.bf16.msra.mxu0 %v451_v12  ;;  %423 = vmatprep.subr.bf16.mxu1 %v490_v1 }
  0x11   :  { %392 = vmatprep.subr.bf16.mxu0 %v452_v13 }
  0x13   :  { %424 = vmatpush3.bf16.msra.mxu1 %v453_v14 }
  0x14   :  { %393 = vmatpush3.bf16.msra.mxu0 %v454_v15  ;;  %425 = vmatprep.subr.bf16.mxu1 %v490_v1 }
  0x15   :  { %394 = vmatprep.subr.bf16.mxu0 %v455_v16 }
  0x17   :  { %426 = vmatpush3.bf16.msra.mxu1 %v456_v17 }
  0x18   :  { %395 = vmatpush3.bf16.msra.mxu0 %v457_v18  ;;  %427 = vmatprep.subr.bf16.mxu1 %v490_v1 }
  0x19   :  { %396 = vmatprep.subr.bf16.mxu0 %v458_v19 }
  0x1a   :  { %8 = vsyncpa [#allocation4], 0  ;;  %v462_v24 = vld [vmem:[%s620_s1 + $0x80] sm:$0xff]   ;;  %269 = vmatprep.mubr.bf16.mxu0 %v466_v23  ;;  %v467_v26 = vld [vmem:[%s619_s0 + $0x8] ss:$12 sps:$4 sm:$0xff]   ;;  %vm20_vm1 = vcmask 261120  }
  0x1b   :  { %428 = vmatpush3.bf16.msra.mxu1 %v459_v20  ;;  %v463_v25 = vld [vmem:[%s620_s1] sm:$0xff]   ;;  %21 = vst.msk [vmem:[#allocation2] sm:$0xff] %vm20_vm1, %v490_v1  ;;  %22 = vst.msk [vmem:[#allocation2 + $0x8] sm:$0xff] %vm20_vm1, %v490_v1  ;;  %s492_s12 = smov [#allocation3]  }
  0x1c   :  { %397 = vmatpush3.bf16.msra.mxu0 %v460_v21  ;;  %429 = vmatprep.subr.bf16.mxu1 %v490_v1  ;;  %v464_v27 = vld [vmem:[%s619_s0] ss:$12 sps:$4 sm:$0xff]   ;;  %s345_s13 = sshll.u32 %s492_s12, 4  ;;  %s346_s13 = int_to_ptr.vmem [resolvable:$true] %s345_s13 }
  0x1d   :  { %398 = vmatprep.subr.bf16.mxu0 %v461_v22  ;;  %v383_v44 = vld [vmem:[%s621_s2] ss:$0 sm:$0xff]  ;;  %s468_s14 = scalar_lea.vmem %s346_s13, 256  ;;  %p473_p1 = scmp.lt.s32.totalorder %s346_s13, %s346_s13 }
  0x1e   :  { %p469_p0 = scmp.ne.s32.totalorder %s346_s13, %s468_s14  ;;  %p474_p2 = scmp.lt.s32.totalorder %s468_s14, %s468_s14 }
  0x1f   :  { %430 = vmatpush3.bf16.msra.mxu1 %v462_v24 }
  0x20   :  { %399 = vmatpush3.bf16.msra.mxu0 %v463_v25  ;;  %p475_p3 = por %p474_p2, %p473_p1 }
  0x22   :  { %432 = vmatmul.mubr.bf16.vlgmr.msra.gmra.mxu1 %v467_v26  ;;  %v23_v34 = vld [vmem:[#allocation2] sm:$0xff]  ;;  %v24_v41 = vld [vmem:[#allocation2 + $0x8] sm:$0xff]  ;;  %p476_p4 = pnand %p475_p3, %p469_p0 }
  0x23   :  { %270 = vmatmul.mubr.bf16.vlgmr.msra.gmra.mxu0 %v464_v27 }
  0xe2   :  { %v312_v28 = vpop.f32.mrf.mxu1 }
  0xe3   :  { %v400_v29 = vpop.f32.mrf.mxu0 }
  0xe4   :  { %v433_v30 = vpop.f32.mrf.mxu1 }
  0xe5   :  { %v401_v31 = vpop.f32.mrf.mxu0 }
  0xe6   :  { %v402_v32 = vadd.f32 %v401_v31, %v400_v29  ;;  %v315_v33 = vpop.f32.mrf.mxu1 }
  0xe7   :  { %v403_v35 = vpop.f32.mrf.mxu0 }
  0xe8   :  { %v313_v36 = vadd.f32 %v402_v32, %v312_v28  ;;  %v434_v37 = vpop.f32.mrf.mxu1 }
  0xe9   :  { %v404_v38 = vpop.f32.mrf.mxu0 }
  0xea   :  { %v319_v39 = vadd.f32 %v313_v36, %v23_v34  ;;  %v405_v40 = vadd.f32 %v404_v38, %v403_v35 }
  0xec   :  { %322 = vst.msk [vmem:[#allocation2] sm:$0xff] %vm20_vm1, %v319_v39  ;;  %v316_v42 = vadd.f32 %v405_v40, %v315_v33 }
  0xee   :  { %v320_v43 = vadd.f32 %v316_v42, %v24_v41 }
  0xf0   :  { %323 = vst.msk [vmem:[#allocation2 + $0x8] sm:$0xff] %vm20_vm1, %v320_v43 }
  0xf3   :  { %v327_v45 = vld [vmem:[#allocation2] sm:$0xff] }
  0xf4   :  { %v336_v46 = vadd.f32 %v383_v44, %v327_v45 }
  0xf6   :  { %338 = vst.msk [vmem:[#allocation3] sm:$0xff] %vm20_vm1, %v336_v46 }
  0xf7   :  { %v328_v47 = vld [vmem:[#allocation2 + $0x8] sm:$0xff] }
  0xf8   :  { %v337_v48 = vadd.f32 %v383_v44, %v328_v47 }
  0xfa   :  { %339 = vst.msk [vmem:[#allocation3 + $0x8] sm:$0xff] %vm20_vm1, %v337_v48 }
  0xfb   :  { %479 = shalt.err (!%p476_p4)
}
  0xfc   :  { %s493_s15 = smov 128   ;;  %s494_s2 = smov 8  }
  0xfd   :  { %351 = dma.vmem_to_hbm [thread:$0]  %s346_s13, 256, %s622_s3, [#allocation4], %s493_s15, %s493_s15, %s494_s2  }
  0xfe   :  { %488 = dma.done.wait [#allocation4], 256  }
  0xff   :  { %489 = vsyncadd [#allocation4], 4294967040 }
 0x100   :  { %355 = vsyncpa [#allocation4], 1 }

</bundles_post_ra>
